<compile_context>
chip_gen: v6e
topology: v6e:2x2x1
jax: 0.10.0
libtpu: 0.0.40
codegen_flags: <defaults>
</compile_context>

<pallas_src>
import numpy as np

import jax
import jax.numpy as jnp
from jax.experimental import pallas as pl
from jax.experimental.pallas import tpu as pltpu


def _spatial_gate_kernel(x_ref, lh_ref, mw_ref, bias_ref, o_ref):
    # x_ref : (1, C, H, W)  one batch element (VMEM)
    # lh_ref: (K, H, H)     row-shift selectors for the K vertical taps (VMEM)
    # mw_ref: (2, K, W, W)  banded column operators, BN-scaled conv weights folded in (VMEM)
    # bias_ref: (1,)        folded BatchNorm bias (SMEM scalar)
    # o_ref : (1, C, H, W)  gated output block
    C = x_ref.shape[1]
    K = lh_ref.shape[0]
    H = x_ref.shape[2]
    W = x_ref.shape[3]

    x = x_ref[0]                                    # (C, H, W)

    # --- ChannelPool: max / mean over channels (VPU, unrolled over small static C) ---
    cmax = x[0]
    csum = x[0]
    for c in range(1, C):
        xc = x[c]
        cmax = jnp.maximum(cmax, xc)
        csum = csum + xc
    cmean = csum * (1.0 / C)

    # --- 7x7 "same" conv as shift-via-matmul (MXU); BN scale already folded into mw ---
    acc = jnp.zeros((H, W), jnp.float32)
    for kh in range(K):
        t = jnp.dot(cmax, mw_ref[0, kh], preferred_element_type=jnp.float32)
        t = t + jnp.dot(cmean, mw_ref[1, kh], preferred_element_type=jnp.float32)
        acc = acc + jnp.dot(lh_ref[kh], t, preferred_element_type=jnp.float32)

    y = acc + bias_ref[0]                           # folded BatchNorm bias
    gate = 1.0 / (1.0 + jnp.exp(-y))                # sigmoid: a single EUP exp

    o_ref[0] = (x * gate[None, :, :]).astype(o_ref.dtype)


def spatial_gate(x, weight, gamma, beta, running_mean, running_var, *, eps=1e-5):
    """SpatialGate forward. x: (B, C, H, W) NCHW; weight: (1, 2, k, k) (PyTorch layout)."""
    B, C, H, W = x.shape
    k = weight.shape[-1]
    pad = (k - 1) // 2

    # Fold BatchNorm (inference) into the conv weights + one scalar bias.
    bn_scale = gamma / jnp.sqrt(running_var + eps)                 # (1,)
    bias = (beta - running_mean * bn_scale).astype(jnp.float32)    # (1,)
    w_f = (weight[0] * bn_scale[0]).astype(jnp.float32)            # (2, k, k)

    # Host-precomputed, weight-only shift operators for "same" padding.
    #   lh[t, h, h'] = 1 iff h' == h + t - pad (in range)   -> (k, H, H)
    #   rw[t, w', w] = 1 iff w' == w + t - pad (in range)   -> (k, W, W)
    lh_np = np.zeros((k, H, H), np.float32)
    rw_np = np.zeros((k, W, W), np.float32)
    for t in range(k):
        for h in range(H):
            src = h + t - pad
            if 0 <= src < H:
                lh_np[t, h, src] = 1.0
        for w in range(W):
            src = w + t - pad
            if 0 <= src < W:
                rw_np[t, src, w] = 1.0
    lh = jnp.asarray(lh_np)
    # mw[c, kh] = sum_kw w_f[c, kh, kw] * rw[kw]  (banded (W, W) operator per tap/channel)
    mw = jnp.einsum("cks,sab->ckab", w_f, jnp.asarray(rw_np))      # (2, k, W, W)

    return pl.pallas_call(
        _spatial_gate_kernel,
        out_shape=jax.ShapeDtypeStruct((B, C, H, W), x.dtype),
        grid_spec=pltpu.PrefetchScalarGridSpec(
            num_scalar_prefetch=0,
            grid=(B,),
            in_specs=[
                pl.BlockSpec((1, C, H, W), lambda b: (b, 0, 0, 0)),
                pl.BlockSpec((k, H, H), lambda b: (0, 0, 0)),
                pl.BlockSpec((2, k, W, W), lambda b: (0, 0, 0, 0)),
                pl.BlockSpec(memory_space=pltpu.MemorySpace.SMEM),
            ],
            out_specs=pl.BlockSpec((1, C, H, W), lambda b: (b, 0, 0, 0)),
        ),
        compiler_params=pltpu.CompilerParams(
            dimension_semantics=("parallel",)),
    )(x, lh, mw, bias)


def _reference(x, weight, gamma, beta, running_mean, running_var, *, eps=1e-5):
    cmax = jnp.max(x, axis=1, keepdims=True)
    cmean = jnp.mean(x, axis=1, keepdims=True)
    comp = jnp.concatenate([cmax, cmean], axis=1)                  # (B, 2, H, W)
    k = weight.shape[-1]
    pad = (k - 1) // 2
    y = jax.lax.conv_general_dilated(
        comp, weight, window_strides=(1, 1),
        padding=[(pad, pad), (pad, pad)],
        dimension_numbers=("NCHW", "OIHW", "NCHW"),
        precision=jax.lax.Precision.HIGHEST)
    scale = gamma / jnp.sqrt(running_var + eps)
    bn_bias = beta - running_mean * scale
    y = y * scale.reshape(1, -1, 1, 1) + bn_bias.reshape(1, -1, 1, 1)
    return x * jax.nn.sigmoid(y)


if __name__ == "__main__":
    key = jax.random.PRNGKey(0)
    B, C, H, W = 2, 4, 16, 16
    ksz = 7

    k1, k2, k3, k4, k5, k6 = jax.random.split(key, 6)
    x = jax.random.normal(k1, (B, C, H, W), dtype=jnp.float32)
    weight = jax.random.normal(k2, (1, 2, ksz, ksz), dtype=jnp.float32) * 0.1
    gamma = 1.0 + 0.1 * jax.random.normal(k3, (1,), dtype=jnp.float32)
    beta = 0.1 * jax.random.normal(k4, (1,), dtype=jnp.float32)
    running_mean = 0.05 * jax.random.normal(k5, (1,), dtype=jnp.float32)
    running_var = jnp.abs(1.0 + 0.1 * jax.random.normal(k6, (1,), dtype=jnp.float32))

    out = spatial_gate(x, weight, gamma, beta, running_mean, running_var)
    out = jax.block_until_ready(out)

    ref = _reference(x, weight, gamma, beta, running_mean, running_var)
    assert out.shape == (B, C, H, W)
    assert jnp.allclose(out, ref, atol=1e-3, rtol=1e-3), float(jnp.max(jnp.abs(out - ref)))

    print("KERNEL_OK")
</pallas_src>

<mosaic_0001>
module attributes {stable_mosaic.version = 11 : i64} {
  func.func @_spatial_gate_kernel(%arg0: i32, %arg1: memref<1x4x16x16xf32, #tpu.memory_space<vmem>>, %arg2: memref<7x16x16xf32, #tpu.memory_space<vmem>>, %arg3: memref<2x7x16x16xf32, #tpu.memory_space<vmem>>, %arg4: memref<1xf32, #tpu.memory_space<smem>>, %arg5: memref<1x4x16x16xf32, #tpu.memory_space<vmem>>) attributes {dimension_semantics = [#tpu.dimension_semantics<parallel>], iteration_bounds = array<i64: 2>, scalar_prefetch = 0 : i64, scratch_operands = 0 : i64, tpu.core_type = #tpu.core_type<tc>, window_params = [{transform_indices = @transform_0, window_bounds = array<i64: 1, 4, 16, 16>}, {pipeline_mode = #tpu.pipeline_mode<synchronous>, transform_indices = @transform_1, window_bounds = array<i64: 7, 16, 16>}, {pipeline_mode = #tpu.pipeline_mode<synchronous>, transform_indices = @transform_2, window_bounds = array<i64: 2, 7, 16, 16>}, {transform_indices = @transform_3, window_bounds = array<i64: 1>}, {transform_indices = @transform_4, window_bounds = array<i64: 1, 4, 16, 16>}]} {
    %c0 = arith.constant 0 : index
    %c0_0 = arith.constant 0 : index
    %c0_1 = arith.constant 0 : index
    %c0_2 = arith.constant 0 : index
    %0 = vector.load %arg1[%c0, %c0_0, %c0_1, %c0_2] : memref<1x4x16x16xf32, #tpu.memory_space<vmem>>, vector<1x4x16x16xf32>
    %1 = vector.shape_cast %0 : vector<1x4x16x16xf32> to vector<4x16x16xf32>
    %2 = vector.extract_strided_slice %1 {offsets = [0, 0, 0], sizes = [1, 16, 16], strides = [1, 1, 1]} : vector<4x16x16xf32> to vector<1x16x16xf32>
    %3 = vector.shape_cast %2 : vector<1x16x16xf32> to vector<16x16xf32>
    %4 = vector.extract_strided_slice %1 {offsets = [0, 0, 0], sizes = [1, 16, 16], strides = [1, 1, 1]} : vector<4x16x16xf32> to vector<1x16x16xf32>
    %5 = vector.shape_cast %4 : vector<1x16x16xf32> to vector<16x16xf32>
    %6 = vector.extract_strided_slice %1 {offsets = [1, 0, 0], sizes = [1, 16, 16], strides = [1, 1, 1]} : vector<4x16x16xf32> to vector<1x16x16xf32>
    %7 = vector.shape_cast %6 : vector<1x16x16xf32> to vector<16x16xf32>
    %8 = arith.maximumf %3, %7 : vector<16x16xf32>
    %9 = arith.addf %5, %7 : vector<16x16xf32>
    %10 = vector.extract_strided_slice %1 {offsets = [2, 0, 0], sizes = [1, 16, 16], strides = [1, 1, 1]} : vector<4x16x16xf32> to vector<1x16x16xf32>
    %11 = vector.shape_cast %10 : vector<1x16x16xf32> to vector<16x16xf32>
    %12 = arith.maximumf %8, %11 : vector<16x16xf32>
    %13 = arith.addf %9, %11 : vector<16x16xf32>
    %14 = vector.extract_strided_slice %1 {offsets = [3, 0, 0], sizes = [1, 16, 16], strides = [1, 1, 1]} : vector<4x16x16xf32> to vector<1x16x16xf32>
    %15 = vector.shape_cast %14 : vector<1x16x16xf32> to vector<16x16xf32>
    %16 = arith.maximumf %12, %15 : vector<16x16xf32>
    %17 = arith.addf %13, %15 : vector<16x16xf32>
    %cst = arith.constant 2.500000e-01 : f32
    %18 = vector.broadcast %cst : f32 to vector<16x16xf32>
    %19 = arith.mulf %17, %18 : vector<16x16xf32>
    %cst_3 = arith.constant 0.000000e+00 : f32
    %20 = vector.broadcast %cst_3 : f32 to vector<16x16xf32>
    %c0_4 = arith.constant 0 : index
    %c0_5 = arith.constant 0 : index
    %c0_6 = arith.constant 0 : index
    %c0_7 = arith.constant 0 : index
    %21 = vector.load %arg3[%c0_4, %c0_5, %c0_6, %c0_7] : memref<2x7x16x16xf32, #tpu.memory_space<vmem>>, vector<1x1x16x16xf32>
    %22 = vector.shape_cast %21 : vector<1x1x16x16xf32> to vector<16x16xf32>
    %cst_8 = arith.constant dense<0.000000e+00> : vector<16x16xf32>
    %23 = tpu.matmul %16, %22, %cst_8 {dimension_numbers = #tpu.dot_dimension_numbers<[1], [0], [0], [1], [0, 0, 1, 1], [], []>} : vector<16x16xf32>, vector<16x16xf32>, vector<16x16xf32> -> vector<16x16xf32>
    %c1 = arith.constant 1 : index
    %c0_9 = arith.constant 0 : index
    %c0_10 = arith.constant 0 : index
    %c0_11 = arith.constant 0 : index
    %24 = vector.load %arg3[%c1, %c0_9, %c0_10, %c0_11] : memref<2x7x16x16xf32, #tpu.memory_space<vmem>>, vector<1x1x16x16xf32>
    %25 = vector.shape_cast %24 : vector<1x1x16x16xf32> to vector<16x16xf32>
    %cst_12 = arith.constant dense<0.000000e+00> : vector<16x16xf32>
    %26 = tpu.matmul %19, %25, %cst_12 {dimension_numbers = #tpu.dot_dimension_numbers<[1], [0], [0], [1], [0, 0, 1, 1], [], []>} : vector<16x16xf32>, vector<16x16xf32>, vector<16x16xf32> -> vector<16x16xf32>
    %27 = arith.addf %23, %26 : vector<16x16xf32>
    %c0_13 = arith.constant 0 : index
    %c0_14 = arith.constant 0 : index
    %c0_15 = arith.constant 0 : index
    %28 = vector.load %arg2[%c0_13, %c0_14, %c0_15] : memref<7x16x16xf32, #tpu.memory_space<vmem>>, vector<1x16x16xf32>
    %29 = vector.shape_cast %28 : vector<1x16x16xf32> to vector<16x16xf32>
    %cst_16 = arith.constant dense<0.000000e+00> : vector<16x16xf32>
    %30 = tpu.matmul %29, %27, %cst_16 {dimension_numbers = #tpu.dot_dimension_numbers<[1], [0], [0], [1], [0, 0, 1, 1], [], []>} : vector<16x16xf32>, vector<16x16xf32>, vector<16x16xf32> -> vector<16x16xf32>
    %31 = arith.addf %20, %30 : vector<16x16xf32>
    %c0_17 = arith.constant 0 : index
    %c1_18 = arith.constant 1 : index
    %c0_19 = arith.constant 0 : index
    %c0_20 = arith.constant 0 : index
    %32 = vector.load %arg3[%c0_17, %c1_18, %c0_19, %c0_20] : memref<2x7x16x16xf32, #tpu.memory_space<vmem>>, vector<1x1x16x16xf32>
    %33 = vector.shape_cast %32 : vector<1x1x16x16xf32> to vector<16x16xf32>
    %cst_21 = arith.constant dense<0.000000e+00> : vector<16x16xf32>
    %34 = tpu.matmul %16, %33, %cst_21 {dimension_numbers = #tpu.dot_dimension_numbers<[1], [0], [0], [1], [0, 0, 1, 1], [], []>} : vector<16x16xf32>, vector<16x16xf32>, vector<16x16xf32> -> vector<16x16xf32>
    %c1_22 = arith.constant 1 : index
    %c1_23 = arith.constant 1 : index
    %c0_24 = arith.constant 0 : index
    %c0_25 = arith.constant 0 : index
    %35 = vector.load %arg3[%c1_22, %c1_23, %c0_24, %c0_25] : memref<2x7x16x16xf32, #tpu.memory_space<vmem>>, vector<1x1x16x16xf32>
    %36 = vector.shape_cast %35 : vector<1x1x16x16xf32> to vector<16x16xf32>
    %cst_26 = arith.constant dense<0.000000e+00> : vector<16x16xf32>
    %37 = tpu.matmul %19, %36, %cst_26 {dimension_numbers = #tpu.dot_dimension_numbers<[1], [0], [0], [1], [0, 0, 1, 1], [], []>} : vector<16x16xf32>, vector<16x16xf32>, vector<16x16xf32> -> vector<16x16xf32>
    %38 = arith.addf %34, %37 : vector<16x16xf32>
    %c1_27 = arith.constant 1 : index
    %c0_28 = arith.constant 0 : index
    %c0_29 = arith.constant 0 : index
    %39 = vector.load %arg2[%c1_27, %c0_28, %c0_29] : memref<7x16x16xf32, #tpu.memory_space<vmem>>, vector<1x16x16xf32>
    %40 = vector.shape_cast %39 : vector<1x16x16xf32> to vector<16x16xf32>
    %cst_30 = arith.constant dense<0.000000e+00> : vector<16x16xf32>
    %41 = tpu.matmul %40, %38, %cst_30 {dimension_numbers = #tpu.dot_dimension_numbers<[1], [0], [0], [1], [0, 0, 1, 1], [], []>} : vector<16x16xf32>, vector<16x16xf32>, vector<16x16xf32> -> vector<16x16xf32>
    %42 = arith.addf %31, %41 : vector<16x16xf32>
    %c0_31 = arith.constant 0 : index
    %c2 = arith.constant 2 : index
    %c0_32 = arith.constant 0 : index
    %c0_33 = arith.constant 0 : index
    %43 = vector.load %arg3[%c0_31, %c2, %c0_32, %c0_33] : memref<2x7x16x16xf32, #tpu.memory_space<vmem>>, vector<1x1x16x16xf32>
    %44 = vector.shape_cast %43 : vector<1x1x16x16xf32> to vector<16x16xf32>
    %cst_34 = arith.constant dense<0.000000e+00> : vector<16x16xf32>
    %45 = tpu.matmul %16, %44, %cst_34 {dimension_numbers = #tpu.dot_dimension_numbers<[1], [0], [0], [1], [0, 0, 1, 1], [], []>} : vector<16x16xf32>, vector<16x16xf32>, vector<16x16xf32> -> vector<16x16xf32>
    %c1_35 = arith.constant 1 : index
    %c2_36 = arith.constant 2 : index
    %c0_37 = arith.constant 0 : index
    %c0_38 = arith.constant 0 : index
    %46 = vector.load %arg3[%c1_35, %c2_36, %c0_37, %c0_38] : memref<2x7x16x16xf32, #tpu.memory_space<vmem>>, vector<1x1x16x16xf32>
    %47 = vector.shape_cast %46 : vector<1x1x16x16xf32> to vector<16x16xf32>
    %cst_39 = arith.constant dense<0.000000e+00> : vector<16x16xf32>
    %48 = tpu.matmul %19, %47, %cst_39 {dimension_numbers = #tpu.dot_dimension_numbers<[1], [0], [0], [1], [0, 0, 1, 1], [], []>} : vector<16x16xf32>, vector<16x16xf32>, vector<16x16xf32> -> vector<16x16xf32>
    %49 = arith.addf %45, %48 : vector<16x16xf32>
    %c2_40 = arith.constant 2 : index
    %c0_41 = arith.constant 0 : index
    %c0_42 = arith.constant 0 : index
    %50 = vector.load %arg2[%c2_40, %c0_41, %c0_42] : memref<7x16x16xf32, #tpu.memory_space<vmem>>, vector<1x16x16xf32>
    %51 = vector.shape_cast %50 : vector<1x16x16xf32> to vector<16x16xf32>
    %cst_43 = arith.constant dense<0.000000e+00> : vector<16x16xf32>
    %52 = tpu.matmul %51, %49, %cst_43 {dimension_numbers = #tpu.dot_dimension_numbers<[1], [0], [0], [1], [0, 0, 1, 1], [], []>} : vector<16x16xf32>, vector<16x16xf32>, vector<16x16xf32> -> vector<16x16xf32>
    %53 = arith.addf %42, %52 : vector<16x16xf32>
    %c0_44 = arith.constant 0 : index
    %c3 = arith.constant 3 : index
    %c0_45 = arith.constant 0 : index
    %c0_46 = arith.constant 0 : index
    %54 = vector.load %arg3[%c0_44, %c3, %c0_45, %c0_46] : memref<2x7x16x16xf32, #tpu.memory_space<vmem>>, vector<1x1x16x16xf32>
    %55 = vector.shape_cast %54 : vector<1x1x16x16xf32> to vector<16x16xf32>
    %cst_47 = arith.constant dense<0.000000e+00> : vector<16x16xf32>
    %56 = tpu.matmul %16, %55, %cst_47 {dimension_numbers = #tpu.dot_dimension_numbers<[1], [0], [0], [1], [0, 0, 1, 1], [], []>} : vector<16x16xf32>, vector<16x16xf32>, vector<16x16xf32> -> vector<16x16xf32>
    %c1_48 = arith.constant 1 : index
    %c3_49 = arith.constant 3 : index
    %c0_50 = arith.constant 0 : index
    %c0_51 = arith.constant 0 : index
    %57 = vector.load %arg3[%c1_48, %c3_49, %c0_50, %c0_51] : memref<2x7x16x16xf32, #tpu.memory_space<vmem>>, vector<1x1x16x16xf32>
    %58 = vector.shape_cast %57 : vector<1x1x16x16xf32> to vector<16x16xf32>
    %cst_52 = arith.constant dense<0.000000e+00> : vector<16x16xf32>
    %59 = tpu.matmul %19, %58, %cst_52 {dimension_numbers = #tpu.dot_dimension_numbers<[1], [0], [0], [1], [0, 0, 1, 1], [], []>} : vector<16x16xf32>, vector<16x16xf32>, vector<16x16xf32> -> vector<16x16xf32>
    %60 = arith.addf %56, %59 : vector<16x16xf32>
    %c3_53 = arith.constant 3 : index
    %c0_54 = arith.constant 0 : index
    %c0_55 = arith.constant 0 : index
    %61 = vector.load %arg2[%c3_53, %c0_54, %c0_55] : memref<7x16x16xf32, #tpu.memory_space<vmem>>, vector<1x16x16xf32>
    %62 = vector.shape_cast %61 : vector<1x16x16xf32> to vector<16x16xf32>
    %cst_56 = arith.constant dense<0.000000e+00> : vector<16x16xf32>
    %63 = tpu.matmul %62, %60, %cst_56 {dimension_numbers = #tpu.dot_dimension_numbers<[1], [0], [0], [1], [0, 0, 1, 1], [], []>} : vector<16x16xf32>, vector<16x16xf32>, vector<16x16xf32> -> vector<16x16xf32>
    %64 = arith.addf %53, %63 : vector<16x16xf32>
    %c0_57 = arith.constant 0 : index
    %c4 = arith.constant 4 : index
    %c0_58 = arith.constant 0 : index
    %c0_59 = arith.constant 0 : index
    %65 = vector.load %arg3[%c0_57, %c4, %c0_58, %c0_59] : memref<2x7x16x16xf32, #tpu.memory_space<vmem>>, vector<1x1x16x16xf32>
    %66 = vector.shape_cast %65 : vector<1x1x16x16xf32> to vector<16x16xf32>
    %cst_60 = arith.constant dense<0.000000e+00> : vector<16x16xf32>
    %67 = tpu.matmul %16, %66, %cst_60 {dimension_numbers = #tpu.dot_dimension_numbers<[1], [0], [0], [1], [0, 0, 1, 1], [], []>} : vector<16x16xf32>, vector<16x16xf32>, vector<16x16xf32> -> vector<16x16xf32>
    %c1_61 = arith.constant 1 : index
    %c4_62 = arith.constant 4 : index
    %c0_63 = arith.constant 0 : index
    %c0_64 = arith.constant 0 : index
    %68 = vector.load %arg3[%c1_61, %c4_62, %c0_63, %c0_64] : memref<2x7x16x16xf32, #tpu.memory_space<vmem>>, vector<1x1x16x16xf32>
    %69 = vector.shape_cast %68 : vector<1x1x16x16xf32> to vector<16x16xf32>
    %cst_65 = arith.constant dense<0.000000e+00> : vector<16x16xf32>
    %70 = tpu.matmul %19, %69, %cst_65 {dimension_numbers = #tpu.dot_dimension_numbers<[1], [0], [0], [1], [0, 0, 1, 1], [], []>} : vector<16x16xf32>, vector<16x16xf32>, vector<16x16xf32> -> vector<16x16xf32>
    %71 = arith.addf %67, %70 : vector<16x16xf32>
    %c4_66 = arith.constant 4 : index
    %c0_67 = arith.constant 0 : index
    %c0_68 = arith.constant 0 : index
    %72 = vector.load %arg2[%c4_66, %c0_67, %c0_68] : memref<7x16x16xf32, #tpu.memory_space<vmem>>, vector<1x16x16xf32>
    %73 = vector.shape_cast %72 : vector<1x16x16xf32> to vector<16x16xf32>
    %cst_69 = arith.constant dense<0.000000e+00> : vector<16x16xf32>
    %74 = tpu.matmul %73, %71, %cst_69 {dimension_numbers = #tpu.dot_dimension_numbers<[1], [0], [0], [1], [0, 0, 1, 1], [], []>} : vector<16x16xf32>, vector<16x16xf32>, vector<16x16xf32> -> vector<16x16xf32>
    %75 = arith.addf %64, %74 : vector<16x16xf32>
    %c0_70 = arith.constant 0 : index
    %c5 = arith.constant 5 : index
    %c0_71 = arith.constant 0 : index
    %c0_72 = arith.constant 0 : index
    %76 = vector.load %arg3[%c0_70, %c5, %c0_71, %c0_72] : memref<2x7x16x16xf32, #tpu.memory_space<vmem>>, vector<1x1x16x16xf32>
    %77 = vector.shape_cast %76 : vector<1x1x16x16xf32> to vector<16x16xf32>
    %cst_73 = arith.constant dense<0.000000e+00> : vector<16x16xf32>
    %78 = tpu.matmul %16, %77, %cst_73 {dimension_numbers = #tpu.dot_dimension_numbers<[1], [0], [0], [1], [0, 0, 1, 1], [], []>} : vector<16x16xf32>, vector<16x16xf32>, vector<16x16xf32> -> vector<16x16xf32>
    %c1_74 = arith.constant 1 : index
    %c5_75 = arith.constant 5 : index
    %c0_76 = arith.constant 0 : index
    %c0_77 = arith.constant 0 : index
    %79 = vector.load %arg3[%c1_74, %c5_75, %c0_76, %c0_77] : memref<2x7x16x16xf32, #tpu.memory_space<vmem>>, vector<1x1x16x16xf32>
    %80 = vector.shape_cast %79 : vector<1x1x16x16xf32> to vector<16x16xf32>
    %cst_78 = arith.constant dense<0.000000e+00> : vector<16x16xf32>
    %81 = tpu.matmul %19, %80, %cst_78 {dimension_numbers = #tpu.dot_dimension_numbers<[1], [0], [0], [1], [0, 0, 1, 1], [], []>} : vector<16x16xf32>, vector<16x16xf32>, vector<16x16xf32> -> vector<16x16xf32>
    %82 = arith.addf %78, %81 : vector<16x16xf32>
    %c5_79 = arith.constant 5 : index
    %c0_80 = arith.constant 0 : index
    %c0_81 = arith.constant 0 : index
    %83 = vector.load %arg2[%c5_79, %c0_80, %c0_81] : memref<7x16x16xf32, #tpu.memory_space<vmem>>, vector<1x16x16xf32>
    %84 = vector.shape_cast %83 : vector<1x16x16xf32> to vector<16x16xf32>
    %cst_82 = arith.constant dense<0.000000e+00> : vector<16x16xf32>
    %85 = tpu.matmul %84, %82, %cst_82 {dimension_numbers = #tpu.dot_dimension_numbers<[1], [0], [0], [1], [0, 0, 1, 1], [], []>} : vector<16x16xf32>, vector<16x16xf32>, vector<16x16xf32> -> vector<16x16xf32>
    %86 = arith.addf %75, %85 : vector<16x16xf32>
    %c0_83 = arith.constant 0 : index
    %c6 = arith.constant 6 : index
    %c0_84 = arith.constant 0 : index
    %c0_85 = arith.constant 0 : index
    %87 = vector.load %arg3[%c0_83, %c6, %c0_84, %c0_85] : memref<2x7x16x16xf32, #tpu.memory_space<vmem>>, vector<1x1x16x16xf32>
    %88 = vector.shape_cast %87 : vector<1x1x16x16xf32> to vector<16x16xf32>
    %cst_86 = arith.constant dense<0.000000e+00> : vector<16x16xf32>
    %89 = tpu.matmul %16, %88, %cst_86 {dimension_numbers = #tpu.dot_dimension_numbers<[1], [0], [0], [1], [0, 0, 1, 1], [], []>} : vector<16x16xf32>, vector<16x16xf32>, vector<16x16xf32> -> vector<16x16xf32>
    %c1_87 = arith.constant 1 : index
    %c6_88 = arith.constant 6 : index
    %c0_89 = arith.constant 0 : index
    %c0_90 = arith.constant 0 : index
    %90 = vector.load %arg3[%c1_87, %c6_88, %c0_89, %c0_90] : memref<2x7x16x16xf32, #tpu.memory_space<vmem>>, vector<1x1x16x16xf32>
    %91 = vector.shape_cast %90 : vector<1x1x16x16xf32> to vector<16x16xf32>
    %cst_91 = arith.constant dense<0.000000e+00> : vector<16x16xf32>
    %92 = tpu.matmul %19, %91, %cst_91 {dimension_numbers = #tpu.dot_dimension_numbers<[1], [0], [0], [1], [0, 0, 1, 1], [], []>} : vector<16x16xf32>, vector<16x16xf32>, vector<16x16xf32> -> vector<16x16xf32>
    %93 = arith.addf %89, %92 : vector<16x16xf32>
    %c6_92 = arith.constant 6 : index
    %c0_93 = arith.constant 0 : index
    %c0_94 = arith.constant 0 : index
    %94 = vector.load %arg2[%c6_92, %c0_93, %c0_94] : memref<7x16x16xf32, #tpu.memory_space<vmem>>, vector<1x16x16xf32>
    %95 = vector.shape_cast %94 : vector<1x16x16xf32> to vector<16x16xf32>
    %cst_95 = arith.constant dense<0.000000e+00> : vector<16x16xf32>
    %96 = tpu.matmul %95, %93, %cst_95 {dimension_numbers = #tpu.dot_dimension_numbers<[1], [0], [0], [1], [0, 0, 1, 1], [], []>} : vector<16x16xf32>, vector<16x16xf32>, vector<16x16xf32> -> vector<16x16xf32>
    %97 = arith.addf %86, %96 : vector<16x16xf32>
    %c0_96 = arith.constant 0 : index
    %98 = memref.load %arg4[%c0_96] : memref<1xf32, #tpu.memory_space<smem>>
    %99 = vector.broadcast %98 : f32 to vector<16x16xf32>
    %100 = arith.addf %97, %99 : vector<16x16xf32>
    %cst_97 = arith.constant 0.000000e+00 : f32
    %101 = vector.broadcast %cst_97 : f32 to vector<16x16xf32>
    %102 = arith.subf %101, %100 : vector<16x16xf32>
    %103 = math.exp %102 : vector<16x16xf32>
    %cst_98 = arith.constant 1.000000e+00 : f32
    %104 = vector.broadcast %cst_98 : f32 to vector<16x16xf32>
    %105 = arith.addf %104, %103 : vector<16x16xf32>
    %cst_99 = arith.constant 1.000000e+00 : f32
    %106 = vector.broadcast %cst_99 : f32 to vector<16x16xf32>
    %107 = arith.divf %106, %105 : vector<16x16xf32>
    %108 = vector.shape_cast %107 : vector<16x16xf32> to vector<1x16x16xf32>
    %109 = vector.broadcast %108 : vector<1x16x16xf32> to vector<4x16x16xf32>
    %110 = arith.mulf %1, %109 : vector<4x16x16xf32>
    %c0_100 = arith.constant 0 : index
    %c0_101 = arith.constant 0 : index
    %c0_102 = arith.constant 0 : index
    %c0_103 = arith.constant 0 : index
    %111 = vector.load %arg5[%c0_100, %c0_101, %c0_102, %c0_103] : memref<1x4x16x16xf32, #tpu.memory_space<vmem>>, vector<1x4x16x16xf32>
    %112 = vector.shape_cast %111 : vector<1x4x16x16xf32> to vector<4x16x16xf32>
    %113 = vector.shape_cast %110 : vector<4x16x16xf32> to vector<1x4x16x16xf32>
    tpu.vector_store %arg5[%c0_100, %c0_101, %c0_102, %c0_103], %113 {strides = array<i32>} : memref<1x4x16x16xf32, #tpu.memory_space<vmem>>, vector<1x4x16x16xf32>,
    return
  }
  func.func @transform_0(%arg0: i32) -> (i32, i32, i32, i32) {
    %c0_i32 = arith.constant 0 : i32
    %c0_i32_0 = arith.constant 0 : i32
    %c0_i32_1 = arith.constant 0 : i32
    %c0_i32_2 = arith.constant 0 : i32
    return %arg0, %c0_i32, %c0_i32_0, %c0_i32_1 : i32, i32, i32, i32
  }
  func.func @transform_1(%arg0: i32) -> (i32, i32, i32) {
    %c0_i32 = arith.constant 0 : i32
    %c0_i32_0 = arith.constant 0 : i32
    %c0_i32_1 = arith.constant 0 : i32
    %c0_i32_2 = arith.constant 0 : i32
    return %c0_i32, %c0_i32_0, %c0_i32_1 : i32, i32, i32
  }
  func.func @transform_2(%arg0: i32) -> (i32, i32, i32, i32) {
    %c0_i32 = arith.constant 0 : i32
    %c0_i32_0 = arith.constant 0 : i32
    %c0_i32_1 = arith.constant 0 : i32
    %c0_i32_2 = arith.constant 0 : i32
    %c0_i32_3 = arith.constant 0 : i32
    return %c0_i32, %c0_i32_0, %c0_i32_1, %c0_i32_2 : i32, i32, i32, i32
  }
  func.func @transform_3(%arg0: i32) -> i32 {
    %c0_i32 = arith.constant 0 : i32
    %c0_i32_0 = arith.constant 0 : i32
    return %c0_i32 : i32
  }
  func.func @transform_4(%arg0: i32) -> (i32, i32, i32, i32) {
    %c0_i32 = arith.constant 0 : i32
    %c0_i32_0 = arith.constant 0 : i32
    %c0_i32_1 = arith.constant 0 : i32
    %c0_i32_2 = arith.constant 0 : i32
    return %arg0, %c0_i32, %c0_i32_0, %c0_i32_1 : i32, i32, i32, i32
  }
}

</mosaic_0001>

<bundles_post_ra>
// kernel: tpu_custom_call.1
= control target key start
LH: loop header
LB: loop body
LE: loop exit
PB: predicated region body
PF: predicated region fallthrough
CT: control target
= control target key end

     0   :  { %s3002_s0 = inlined_call_operand.hbm [shape: f32[2,4,16,16], index: 0, kind: input, shape index: {}]   ;;  %s3003_s1 = inlined_call_operand.hbm [shape: f32[7,16,16], index: 1, kind: input, shape index: {}]   ;;  %s3004_s2 = inlined_call_operand.hbm [shape: f32[2,7,16,16], index: 2, kind: input, shape index: {}]   ;;  %s3005_s3 = inlined_call_operand.<no memory space> [shape: f32[1], index: 3, kind: input, shape index: {}]   ;;  %s3006_s4 = inlined_call_operand.hbm [shape: f32[2,4,16,16], index: 4, kind: output, shape index: {}]  }
   0x1   :  { %9 = sst [smem:[#allocation2]] %s3005_s3 }
   0x2   :  { %10 = vsyncpa [#allocation4], 0 }
   0x3   :  { %12 = vsyncpa [#allocation4 + $0x1], 0 }
   0x4   :  { %13 = vsyncpa [#allocation7], 0 }
   0x5   :  { %14 = vsyncpa [#allocation5], 0 }
   0x6   :  { %16 = vsyncpa [#allocation5 + $0x1], 0  ;;  %s2665_s17 = smov 0   ;;  %s2667_s18 = smov 0  }
   0x7   :  { %s2669_s19 = smov 0   ;;  %s2671_s20 = smov 0  }
   0x8 LB: > { %s2686_s3 = sadd.s32 4294967295, %s2627_s20   ;;  %s2107_s21 = sadd.s32 4294967294, %s2627_s20   ;;  %s2627_s20 = sphi %s2671_s20, %s3027_s20   ;;  %s2623_s19 = sphi %s2669_s19, %s3026_s19   ;;  %s2619_s18 = sphi %s2667_s18, %s3025_s18   ;;  %s2615_s17 = sphi %s2665_s17, %s3024_s17  }
   0x9   : > { %p42_p0 = scmp.ne.s32.totalorder %s2619_s18, %s2615_s17  ;;  %p3007_p1 = scmp.eq.s32.totalorder %s2686_s3, 0 }
   0xa   : > { %p129_p2 = scmp.eq.s32.totalorder %s2686_s3, 1  ;;  %p135_p3 = scmp.eq.s32.totalorder %s2107_s21, 1 }
   0xb   : > { %p2695_p4 = por %p3007_p1, %p42_p0  ;;  %p2108_p5 = scmp.ge.s32.totalorder %s2627_s20, 1 }
   0xc   : > { %p2700_p6 = por %p135_p3, %p42_p0  ;;  %p142_p7 = scmp.lt.s32.totalorder %s2627_s20, 3 }
   0xd   : > { %s3011_s22 = scalar_select %p2695_p4, 1, 0 }
   0xe   : > { %s3012_s23 = scalar_select %p2700_p6, 1, 0 }
   0xf   : > { %p2705_p8 = pnand %p2108_p5, %p142_p7  ;;  %s2629_s25 = smov [#allocation6]  }
  0x10   : > { %s154_s26 = sshll.u32 %s2629_s25, 4  ;;  %s2630_s28 = smov [#allocation8]   ;;  %s155_s26 = int_to_ptr.vmem [resolvable:$true] %s154_s26 }
  0x11   : > { %s3013_s24 = scalar_select %p2705_p8, 1, 0 }
  0x12   : > { %p2412_p9 = pneg %p2705_p8  ;;  %s167_s29 = sshll.u32 %s2630_s28, 4  ;;  %s168_s29 = int_to_ptr.vmem [resolvable:$true] %s167_s29 }
  0x13   : > { %s2490_s30 = scalar_lea.vmem %s155_s26, 1792  ;;  %p2498_p5 = scmp.lt.s32.totalorder %s155_s26, %s155_s26 }
  0x14   : > { %p2714_p11 = pnand %p2412_p9, %p3007_p1  ;;  %p2491_p13 = scmp.ne.s32.totalorder %s155_s26, %s2490_s30 }
  0x15   : > { %p2499_p7 = scmp.lt.s32.totalorder %s2490_s30, %s2490_s30 }
  0x16   : > { %p2481_p12 = pneg %p2714_p11 }
  0x17   : > { %p2500_p10 = por %p2499_p7, %p2498_p5 }
  0x18   : > { %p2493_p0 = pnand %p2491_p13, %p2481_p12 }
  0x1a   : > { %p2494_p3 = pneg %p2493_p0 }
  0x1c   : > { %p2501_p9 = pnand %p2500_p10, %p2494_p3 }
  0x1e   : > { %2504 = shalt.err (!%p2501_p9)
}
  0x1f   : > { %s2631_s5 = smov 128   ;;  %s2632_s6 = smov 8  }
  0x20   : > { %2415 = dma.hbm_to_vmem [thread:$0]  (!%p2714_p11), %s3003_s1, 1792, %s155_s26, [#allocation7], %s2631_s5, %s2631_s5, %s2632_s6  }
  0x21   : > { %s2516_s9 = scalar_lea.vmem %s168_s29, 3584  ;;  %p2524_p10 = scmp.lt.s32.totalorder %s168_s29, %s168_s29 }
  0x22   : > { %p2517_p13 = scmp.ne.s32.totalorder %s168_s29, %s2516_s9  ;;  %p2525_p3 = scmp.lt.s32.totalorder %s2516_s9, %s2516_s9 }
  0x24   : > { %p2519_p0 = pnand %p2517_p13, %p2481_p12  ;;  %p2526_p7 = por %p2525_p3, %p2524_p10 }
  0x26   : > { %p2520_p5 = pneg %p2519_p0 }
  0x28   : > { %p2527_p9 = pnand %p2526_p7, %p2520_p5 }
  0x2a   : > { %2530 = shalt.err (!%p2527_p9)
}
  0x2b   : > { %2418 = dma.hbm_to_vmem [thread:$0]  (!%p2714_p11), %s3004_s2, 3584, %s168_s29, [#allocation7], %s2631_s5, %s2631_s5, %s2632_s6  }
  0x2c   : > { %s2743_s12 = sadd.s32 1, %s2627_s20   ;;  %s29_s13 = sadd.s32 1, %s2623_s19 }
  0x2d   : > { %s26_s14 = ssub.s32 %s2627_s20, %s2743_s12  ;;  %p36_p12 = scmp.ne.s32.totalorder %s2623_s19, %s2619_s18 }
  0x2e   : > { %p27_p13 = scmp.eq.s32.totalorder %s26_s14, 0  ;;  %p37_p0 = scmp.eq.s32.totalorder %s2627_s20, 0 }
  0x2f   : > { %p2753_p5 = por %p129_p2, %p36_p12  ;;  %p2429_p10 = scmp.lt.s32.totalorder %s2627_s20, 2 }
  0x30   : > { %s2759_s16 = scalar_select %p27_p13, %s2623_s19, %s29_s13  }
  0x31   : > { %s3015_s15 = scalar_select %p2753_p5, 1, 0 }
  0x32   : > { %p38_p3 = por %p37_p0, %p36_p12  ;;  %s184_s21 = sand.u32 1, %s2623_s19  }
  0x33   : > { %s2112_s25 = sshll.u32 %s184_s21, 6  ;;  %s2167_s26 = sshll.u32 %s2627_s20, 10 }
  0x34   : > { %s2766_s29 = scalar_lea.hbm %s3002_s0, %s2167_s26  ;;  %s188_s30 = scalar_lea.vmem [#allocation3], %s2112_s25 }
  0x35   : > { %s195_s7 = sshll.u32 %s188_s30, 4  ;;  %p2770_p2 = pnand %p2429_p10, %p38_p3  ;;  %s2768_s7 = int_to_ptr.vmem [resolvable:$true] %s195_s7 }
  0x36   : > { %s2774_s9 = scalar_lea.sflag [#allocation4], %s184_s21  ;;  %s2531_s10 = scalar_lea.hbm %s2766_s29, 1024 }
  0x37   : > { %p2532_p11 = scmp.ne.s32.totalorder %s2766_s29, %s2531_s10  ;;  %p2533_p7 = pneg %p2770_p2 }
  0x38   : > { %s2536_s14 = scalar_lea.hbm %s3002_s0, 2048  ;;  %p2537_p13 = scmp.lt.s32.totalorder %s2766_s29, %s3002_s0 }
  0x39   : > { %p2534_p9 = pnand %p2533_p7, %p2532_p11  ;;  %p2538_p0 = scmp.lt.s32.totalorder %s2536_s14, %s2531_s10 }
  0x3b   : > { %p2535_p12 = pneg %p2534_p9  ;;  %p2539_p10 = por %p2538_p0, %p2537_p13 }
  0x3d   : > { %p2540_p3 = pnand %p2539_p10, %p2535_p12 }
  0x3f   : > { %2543 = shalt.err (!%p2540_p3)
}
  0x40   : > { %s2544_s21 = scalar_lea.vmem %s2768_s7, 1024  ;;  %s2633_s27 = smov [#allocation3]  }
  0x41   : > { %p2545_p1 = scmp.ne.s32.totalorder %s2768_s7, %s2544_s21  ;;  %s2549_s28 = sshll.u32 %s2633_s27, 4  ;;  %s2550_s28 = int_to_ptr.vmem [resolvable:$false] %s2549_s28 }
  0x42   : > { %s2551_s30 = scalar_lea.vmem %s2550_s28, 2048  ;;  %p2552_p9 = scmp.lt.s32.totalorder %s2768_s7, %s2550_s28 }
  0x43   : > { %p2547_p6 = pnand %p2545_p1, %p2533_p7  ;;  %p2553_p5 = scmp.lt.s32.totalorder %s2551_s30, %s2544_s21 }
  0x45   : > { %p2548_p11 = pneg %p2547_p6  ;;  %p2554_p4 = por %p2553_p5, %p2552_p9 }
  0x47   : > { %p2555_p8 = pnand %p2554_p4, %p2548_p11 }
  0x49   : > { %2558 = shalt.err (!%p2555_p8)
}
  0x4a   : > { %2422 = dma.hbm_to_vmem [thread:$0]  (!%p2770_p2), %s2766_s29, 1024, %s2768_s7, %s2774_s9, %s2631_s5, %s2631_s5, %s2632_s6  }
  0x4b   : > { %p3017_p1 = scmp.ne.s32.totalorder %s3013_s24, 0 }
  0x4c   : > { %s2801_s10 = sand.u32 (!%p3017_p1), 1, %s2619_s18   ;;  %p3018_p4 = scmp.ne.s32.totalorder (!%p3017_p1), %s3011_s22, 0 }
  0x4d   : > { %207 = sbr.rel (%p3017_p1) target bundleno = 1569 (0x621), region = 36  ;;  %s2116_s11 = sshll.u32 (!%p3017_p1), %s2801_s10, 6 }
  0x4e   : > { %s210_s13 = scalar_lea.sflag (!%p3017_p1), [#allocation4], %s2801_s10  ;;  %s2807_s8 = scalar_lea.vmem (!%p3017_p1), [#allocation3], %s2116_s11 }
  0x52   : > { %2602 = dma.done.wait (%p3018_p4), %s210_s13, 1024  }
  0x53   : > { %2604 = vsyncadd (%p3018_p4), %s210_s13, 4294966272  ;;  %p3019_p6 = scmp.eq.s32.totalorder %s2686_s3, 0 }
  0x55   : > { %2606 = dma.done.wait (%p3019_p6), [#allocation7], 5376   ;;  %p3020_p8 = pmov %p3019_p6 }
  0x56   : > { %v269_v0 = vld [vmem:[#allocation8 + $0x8] sm:$0xff]  ;;  %v272_v1 = vld [vmem:[#allocation8 + $0x78] sm:$0xff]  ;;  %v268_v2 = vld [vmem:[#allocation8] sm:$0xff]  ;;  %vm273_vm0 = vcmask 130048   ;;  %s1969_s22 = sld [smem:[#allocation2]]  ;;  %s2168_s24 = sshll.u32 %s2686_s3, 10 }
  0x57   : > { %2608 = vsyncadd (%p3020_p8), [#allocation7], 4294961920  ;;  %2260 = vmatprep.subr.mxu1 %v269_v0  ;;  %2253 = vmatprep.subr.mxu0 %v272_v1  ;;  %v2818_v3 = vld [vmem:[%s2807_s8] sm:$0xff]  ;;  %v2821_v4 = vld [vmem:[%s2807_s8 + $0x10] sm:$0xff]  ;;  %s245_s5 = scalar_lea.vmem [#allocation9], %s2116_s11  ;;  %s2945_s9 = scalar_lea.hbm %s3006_s4, %s2168_s24 }
  0x58   : > { %v2824_v5 = vld [vmem:[%s2807_s8 + $0x20] sm:$0xff]  ;;  %2261 = vmatpush3.msra.mxu1 %v269_v0  ;;  %2254 = vmatpush3.msra.mxu0 %v272_v1  ;;  %v254_v6 = vmax.f32 %v2818_v3, %v2821_v4  ;;  %v2829_v8 = vld [vmem:[%s2807_s8 + $0x8] sm:$0xff]  ;;  %v256_v9 = vadd.f32 %v2821_v4, %v2818_v3  ;;  %v2834_v10 = vld [vmem:[%s2807_s8 + $0x30] sm:$0xff]  ;;  %s2015_s6 = sshll.u32 %s245_s5, 4  ;;  %s2002_s3 = scalar_lea.sflag [#allocation5], %s2801_s10  ;;  %s2947_s6 = int_to_ptr.vmem [resolvable:$true] %s2015_s6 }
  0x59   : > { %v271_v7 = vld [vmem:[#allocation8 + $0x70] sm:$0xff]  ;;  %2262 = vmatprep.subr.mxu1 %v268_v2  ;;  %v2837_v11 = vld [vmem:[%s2807_s8 + $0x18] sm:$0xff]  ;;  %v2840_v12 = vld [vmem:[%s2807_s8 + $0x28] sm:$0xff]  ;;  %s2559_s14 = scalar_lea.vmem %s2947_s6, 1024  ;;  %p3021_p2 = scmp.ne.s32.totalorder %s3015_s15, 0 }
  0x5a   : > { %2255 = vmatprep.subr.mxu0 %v271_v7  ;;  %2263 = vmatpush3.msra.mxu1 %v268_v2  ;;  %v258_v13 = vmax.f32 %v254_v6, %v2824_v5  ;;  %v255_v14 = vmax.f32 %v2829_v8, %v2837_v11  ;;  %v440_v15 = vld [vmem:[#allocation8 + $0x18] sm:$0xff]  ;;  %v260_v16 = vadd.f32 %v256_v9, %v2824_v5  ;;  %v443_v17 = vld [vmem:[#allocation8 + $0x88] sm:$0xff]  ;;  %v439_v27 = vld [vmem:[#allocation8 + $0x10] sm:$0xff]  ;;  %p2560_p5 = scmp.ne.s32.totalorder %s2947_s6, %s2559_s14  ;;  %s2634_s25 = smov [#allocation9]  }
  0x5b   : > { %2256 = vmatpush3.msra.mxu0 %v271_v7  ;;  %v2847_v18 = vld [vmem:[%s2807_s8 + $0x38] sm:$0xff]  ;;  %2274 = vmatprep.subr.mxu1 %v440_v15  ;;  %v257_v19 = vadd.f32 %v2837_v11, %v2829_v8  ;;  %v442_v29 = vld [vmem:[#allocation8 + $0x80] sm:$0xff]  ;;  %v436_v30 = vld [vmem:[#allocation6] sm:$0xff]  ;;  %s2563_s26 = sshll.u32 %s2634_s25, 4  ;;  %s2564_s26 = int_to_ptr.vmem [resolvable:$false] %s2563_s26 }
  0x5c   : > { %2267 = vmatprep.subr.mxu0 %v443_v17  ;;  %v2852_v20 = vmax.f32 %v258_v13, %v2834_v10  ;;  %v259_v21 = vmax.f32 %v255_v14, %v2840_v12  ;;  %v264_v22 = vadd.f32 %v260_v16, %v2834_v10  ;;  %v595_v31 = vld [vmem:[#allocation6 + $0x10] sm:$0xff]  ;;  %v437_v40 = vld [vmem:[#allocation6 + $0x8] sm:$0xff]  ;;  %v761_v42 = vld [vmem:[#allocation8 + $0x28] sm:$0xff]  ;;  %p2561_p7 = pnand %p2560_p5, %p3021_p2  ;;  %s2565_s21 = scalar_lea.vmem %s2564_s26, 2048 }
  0x5d   : > { %v261_v23 = vadd.f32 %v257_v19, %v2840_v12  ;;  %v760_v46 = vld [vmem:[#allocation8 + $0x20] sm:$0xff]  ;;  %v596_v47 = vld [vmem:[#allocation6 + $0x18] sm:$0xff]  ;;  %v764_v48 = vld [vmem:[#allocation8 + $0x98] sm:$0xff]  ;;  %p2566_p13 = scmp.lt.s32.totalorder %s2947_s6, %s2564_s26  ;;  %p2567_p0 = scmp.lt.s32.totalorder %s2565_s21, %s2559_s14 }
  0x5e   : > { %2264 = vmatprep.mubr.msk.f32.mxu1 %vm273_vm0, %v2852_v20  ;;  %v2860_v24 = vmax.f32 %v259_v21, %v2847_v18  ;;  %v2862_v25 = vmul.f32 0.25, %v264_v22  ;;  %v763_v49 = vld [vmem:[#allocation8 + $0x90] sm:$0xff]  ;;  %v1006_v50 = vld [vmem:[#allocation8 + $0xa8] sm:$0xff]  ;;  %v1005_v52 = vld [vmem:[#allocation8 + $0xa0] sm:$0xff]  ;;  %p2562_p12 = pneg %p2561_p7 }
  0x5f   : > { %v265_v26 = vadd.f32 %v261_v23, %v2847_v18  ;;  %v916_v51 = vld [vmem:[#allocation6 + $0x20] sm:$0xff]  ;;  %v917_v1 = vld [vmem:[#allocation6 + $0x28] sm:$0xff]  ;;  %v1158_v9 = vld [vmem:[#allocation6 + $0x30] sm:$0xff]  ;;  %p2568_p10 = por %p2567_p0, %p2566_p13 }
  0x60   : > { %2265 = vmatmul.mubr.msk.f32.vlgmr.msra.gmra.mxu1 %vm273_vm0, %v2860_v24  ;;  %2257 = vmatprep.mubr.msk.f32.mxu0 %vm273_vm0, %v2862_v25  ;;  %v1003_v2 = vld [vmem:[#allocation8 + $0x38] sm:$0xff]  ;;  %v1002_v6 = vld [vmem:[#allocation8 + $0x30] sm:$0xff] }
  0x61   : > { %2275 = vmatpush3.msra.mxu1 %v440_v15  ;;  %v2869_v28 = vmul.f32 0.25, %v265_v26  ;;  %2278 = vmatprep.mubr.msk.f32.mxu1 %vm273_vm0, %v2852_v20  ;;  %v1248_v7 = vld [vmem:[#allocation8 + $0xb8] sm:$0xff]  ;;  %v1247_v13 = vld [vmem:[#allocation8 + $0xb0] sm:$0xff]  ;;  %p2569_p3 = pnand %p2568_p10, %p2562_p12 }
  0x62   : > { %2276 = vmatprep.subr.mxu1 %v439_v27 }
  0x63   : > { %2258 = vmatmul.mubr.msk.f32.vlgmr.msra.gmra.mxu0 %vm273_vm0, %v2869_v28  ;;  %2277 = vmatpush3.msra.mxu1 %v439_v27 }
  0x64   : > { %2268 = vmatpush3.msra.mxu0 %v443_v17  ;;  %2279 = vmatmul.mubr.msk.f32.vlgmr.msra.gmra.mxu1 %vm273_vm0, %v2860_v24 }
  0x65   : > { %2269 = vmatprep.subr.mxu0 %v442_v29  ;;  %2271 = vmatprep.mubr.msk.f32.mxu0 %vm273_vm0, %v2862_v25 }
  0x66   : > { %2270 = vmatpush3.msra.mxu0 %v442_v29  ;;  %2292 = vmatprep.mubr.msk.f32.mxu1 %vm273_vm0, %v436_v30  ;;  %v1159_v29 = vld [vmem:[#allocation6 + $0x38] sm:$0xff] }
  0x67   : > { %2272 = vmatmul.mubr.msk.f32.vlgmr.msra.gmra.mxu0 %vm273_vm0, %v2869_v28  ;;  %v1245_v30 = vld [vmem:[#allocation8 + $0x48] sm:$0xff] }
  0x68   : > { %2285 = vmatprep.mubr.msk.f32.mxu0 %vm273_vm0, %v595_v31  ;;  %v1244_v31 = vld [vmem:[#allocation8 + $0x40] sm:$0xff] }
 0x120   : > { %v2266_v32 = vpop.f32.mrf.mxu1 }
 0x122   : > { %v427_v33 = vpop.f32.mrf.mxu1 }
 0x123   : > { %v2259_v34 = vpop.f32.mrf.mxu0 }
 0x124   : > { %v433_v35 = vadd.f32 %v2266_v32, %v2259_v34  ;;  %v2280_v37 = vpop.f32.mrf.mxu1  ;;  %v1490_v32 = vld [vmem:[#allocation8 + $0xc8] sm:$0xff]  ;;  %v1489_v34 = vld [vmem:[#allocation8 + $0xc0] sm:$0xff] }
 0x125   : > { %v346_v36 = vpop.f32.mrf.mxu0 }
 0x126   : > { %v428_v38 = vadd.f32 %v427_v33, %v346_v36  ;;  %2288 = vmatprep.subr.mxu1 %v433_v35  ;;  %v585_v43 = vpop.f32.mrf.mxu1  ;;  %v1400_v33 = vld [vmem:[#allocation6 + $0x40] sm:$0xff] }
 0x127   : > { %v2273_v39 = vpop.f32.mrf.mxu0  ;;  %2289 = vmatpush3.msra.mxu1 %v433_v35 }
 0x128   : > { %v591_v41 = vadd.f32 %v2280_v37, %v2273_v39  ;;  %2290 = vmatprep.subr.mxu1 %v428_v38 }
 0x129   : > { %v510_v44 = vpop.f32.mrf.mxu0  ;;  %2291 = vmatpush3.msra.mxu1 %v428_v38 }
 0x12a   : > { %v586_v45 = vadd.f32 %v585_v43, %v510_v44  ;;  %2281 = vmatprep.subr.mxu0 %v591_v41  ;;  %2293 = vmatmul.mubr.msk.f32.vlgmr.msra.gmra.mxu1 %vm273_vm0, %v437_v40 }
 0x12b   : > { %2282 = vmatpush3.msra.mxu0 %v591_v41  ;;  %2302 = vmatprep.subr.mxu1 %v761_v42 }
 0x12c   : > { %2283 = vmatprep.subr.mxu0 %v586_v45  ;;  %2303 = vmatpush3.msra.mxu1 %v761_v42 }
 0x12d   : > { %2284 = vmatpush3.msra.mxu0 %v586_v45  ;;  %2304 = vmatprep.subr.mxu1 %v760_v46  ;;  %v1401_v45 = vld [vmem:[#allocation6 + $0x48] sm:$0xff] }
 0x12e   : > { %2286 = vmatmul.mubr.msk.f32.vlgmr.msra.gmra.mxu0 %vm273_vm0, %v596_v47  ;;  %2295 = vmatprep.subr.mxu0 %v764_v48  ;;  %v1486_v47 = vld [vmem:[#allocation8 + $0x50] sm:$0xff] }
 0x12f   : > { %2296 = vmatpush3.msra.mxu0 %v764_v48  ;;  %2305 = vmatpush3.msra.mxu1 %v760_v46  ;;  %v1487_v46 = vld [vmem:[#allocation8 + $0x58] sm:$0xff] }
 0x130   : > { %2306 = vmatprep.mubr.msk.f32.mxu1 %vm273_vm0, %v2852_v20  ;;  %2297 = vmatprep.subr.mxu0 %v763_v49  ;;  %v1732_v48 = vld [vmem:[#allocation8 + $0xd8] sm:$0xff] }
 0x131   : > { %2307 = vmatmul.mubr.msk.f32.vlgmr.msra.gmra.mxu1 %vm273_vm0, %v2860_v24  ;;  %2298 = vmatpush3.msra.mxu0 %v763_v49  ;;  %v1642_v49 = vld [vmem:[#allocation6 + $0x50] sm:$0xff] }
 0x132   : > { %2299 = vmatprep.mubr.msk.f32.mxu0 %vm273_vm0, %v2862_v25  ;;  %2320 = vmatprep.mubr.msk.f32.mxu1 %vm273_vm0, %v2862_v25 }
 0x133   : > { %2300 = vmatmul.mubr.msk.f32.vlgmr.msra.gmra.mxu0 %vm273_vm0, %v2869_v28  ;;  %2316 = vmatprep.subr.mxu1 %v1006_v50 }
 0x134   : > { %2313 = vmatprep.mubr.msk.f32.mxu0 %vm273_vm0, %v916_v51  ;;  %2317 = vmatpush3.msra.mxu1 %v1006_v50  ;;  %v1731_v50 = vld [vmem:[#allocation8 + $0xd0] sm:$0xff] }
 0x135   : > { %2318 = vmatprep.subr.mxu1 %v1005_v52 }
 0x136   : > { %2319 = vmatpush3.msra.mxu1 %v1005_v52 }
 0x137   : > { %2321 = vmatmul.mubr.msk.f32.vlgmr.msra.gmra.mxu1 %vm273_vm0, %v2869_v28 }
 0x138   : > { %2334 = vmatprep.mubr.msk.f32.mxu1 %vm273_vm0, %v1158_v9 }
 0x1ea   : > { %v2294_v53 = vpop.f32.mrf.mxu1 }
 0x1ec   : > { %v750_v54 = vpop.f32.mrf.mxu1 }
 0x1ee   : > { %v2287_v55 = vpop.f32.mrf.mxu0 }
 0x1ef   : > { %v756_v56 = vadd.f32 %v2294_v53, %v2287_v55 }
 0x1f0   : > { %v669_v57 = vpop.f32.mrf.mxu0 }
 0x1f1   : > { %v751_v58 = vadd.f32 %v750_v54, %v669_v57  ;;  %v2308_v59 = vpop.f32.mrf.mxu1 }
 0x1f3   : > { %v2301_v60 = vpop.f32.mrf.mxu0  ;;  %v906_v62 = vpop.f32.mrf.mxu1 }
 0x1f4   : > { %v912_v61 = vadd.f32 %v2308_v59, %v2301_v60  ;;  %v1643_v60 = vld [vmem:[#allocation6 + $0x58] sm:$0xff] }
 0x1f5   : > { %v831_v63 = vpop.f32.mrf.mxu0 }
 0x1f6   : > { %v907_v0 = vadd.f32 %v906_v62, %v831_v63  ;;  %2309 = vmatprep.subr.mxu0 %v912_v61  ;;  %v1728_v62 = vld [vmem:[#allocation8 + $0x60] sm:$0xff] }
 0x1f7   : > { %2310 = vmatpush3.msra.mxu0 %v912_v61  ;;  %v2322_v17 = vpop.f32.mrf.mxu1  ;;  %v1729_v61 = vld [vmem:[#allocation8 + $0x68] sm:$0xff] }
 0x1f8   : > { %2311 = vmatprep.subr.mxu0 %v907_v0 }
 0x1f9   : > { %2312 = vmatpush3.msra.mxu0 %v907_v0  ;;  %v1073_v23 = vpop.f32.mrf.mxu1 }
 0x1fa   : > { %2314 = vmatmul.mubr.msk.f32.vlgmr.msra.gmra.mxu0 %vm273_vm0, %v917_v1  ;;  %2323 = vmatprep.subr.mxu0 %v1003_v2 }
 0x1fb   : > { %2324 = vmatpush3.msra.mxu0 %v1003_v2  ;;  %2327 = vmatprep.mubr.msk.f32.mxu0 %vm273_vm0, %v2852_v20 }
 0x1fc   : > { %2325 = vmatprep.subr.mxu0 %v1002_v6 }
 0x1fd   : > { %2326 = vmatpush3.msra.mxu0 %v1002_v6 }
 0x1fe   : > { %2328 = vmatmul.mubr.msk.f32.vlgmr.msra.gmra.mxu0 %vm273_vm0, %v2860_v24  ;;  %2337 = vmatprep.subr.mxu0 %v1248_v7 }
 0x1ff   : > { %2341 = vmatprep.mubr.msk.f32.mxu0 %vm273_vm0, %v2862_v25  ;;  %2338 = vmatpush3.msra.mxu0 %v1248_v7 }
 0x200   : > { %2339 = vmatprep.subr.mxu0 %v1247_v13 }
 0x201   : > { %2340 = vmatpush3.msra.mxu0 %v1247_v13 }
 0x202   : > { %2342 = vmatmul.mubr.msk.f32.vlgmr.msra.gmra.mxu0 %vm273_vm0, %v2869_v28 }
 0x203   : > { %2355 = vmatprep.mubr.msk.f32.mxu0 %vm273_vm0, %v1400_v33 }
 0x2ba   : > { %v2315_v14 = vpop.f32.mrf.mxu0 }
 0x2bb   : > { %v1000_v15 = vadd.f32 %v2315_v14, %v756_v56 }
 0x2bc   : > { %v990_v16 = vpop.f32.mrf.mxu0 }
 0x2bd   : > { %v999_v19 = vadd.f32 %v990_v16, %v751_v58  ;;  %v1970_v16 = vstv %s1969_s22 }
 0x2be   : > { %v2329_v21 = vpop.f32.mrf.mxu0 }
 0x2bf   : > { %v1154_v22 = vadd.f32 %v2329_v21, %v2322_v17 }
 0x2c0   : > { %v1148_v26 = vpop.f32.mrf.mxu0 }
 0x2c1   : > { %v1149_v27 = vadd.f32 %v1148_v26, %v1073_v23  ;;  %2330 = vmatprep.subr.mxu1 %v1154_v22 }
 0x2c2   : > { %2331 = vmatpush3.msra.mxu1 %v1154_v22  ;;  %v2343_v38 = vpop.f32.mrf.mxu0 }
 0x2c3   : > { %2332 = vmatprep.subr.mxu1 %v1149_v27 }
 0x2c4   : > { %2333 = vmatpush3.msra.mxu1 %v1149_v27  ;;  %v1315_v42 = vpop.f32.mrf.mxu0 }
 0x2c5   : > { %2335 = vmatmul.mubr.msk.f32.vlgmr.msra.gmra.mxu1 %vm273_vm0, %v1159_v29  ;;  %2344 = vmatprep.subr.mxu1 %v1245_v30 }
 0x2c6   : > { %2345 = vmatpush3.msra.mxu1 %v1245_v30  ;;  %2348 = vmatprep.mubr.msk.f32.mxu1 %vm273_vm0, %v2852_v20 }
 0x2c7   : > { %2346 = vmatprep.subr.mxu1 %v1244_v31 }
 0x2c8   : > { %2347 = vmatpush3.msra.mxu1 %v1244_v31 }
 0x2c9   : > { %2349 = vmatmul.mubr.msk.f32.vlgmr.msra.gmra.mxu1 %vm273_vm0, %v2860_v24  ;;  %2358 = vmatprep.subr.mxu1 %v1490_v32 }
 0x2ca   : > { %2362 = vmatprep.mubr.msk.f32.mxu1 %vm273_vm0, %v2862_v25  ;;  %2359 = vmatpush3.msra.mxu1 %v1490_v32 }
 0x2cb   : > { %2360 = vmatprep.subr.mxu1 %v1489_v34 }
 0x2cc   : > { %2361 = vmatpush3.msra.mxu1 %v1489_v34 }
 0x2cd   : > { %2363 = vmatmul.mubr.msk.f32.vlgmr.msra.gmra.mxu1 %vm273_vm0, %v2869_v28 }
 0x2ce   : > { %2376 = vmatprep.mubr.msk.f32.mxu1 %vm273_vm0, %v1642_v49 }
 0x385   : > { %v2336_v35 = vpop.f32.mrf.mxu1 }
 0x386   : > { %v1242_v36 = vadd.f32 %v2336_v35, %v1000_v15 }
 0x387   : > { %v1232_v37 = vpop.f32.mrf.mxu1 }
 0x388   : > { %v1241_v39 = vadd.f32 %v1232_v37, %v999_v19 }
 0x389   : > { %v2350_v40 = vpop.f32.mrf.mxu1 }
 0x38a   : > { %v1396_v41 = vadd.f32 %v2350_v40, %v2343_v38 }
 0x38b   : > { %v1390_v43 = vpop.f32.mrf.mxu1 }
 0x38c   : > { %v1391_v44 = vadd.f32 %v1390_v43, %v1315_v42  ;;  %2351 = vmatprep.subr.mxu0 %v1396_v41 }
 0x38d   : > { %2352 = vmatpush3.msra.mxu0 %v1396_v41  ;;  %v2364_v54 = vpop.f32.mrf.mxu1 }
 0x38e   : > { %2353 = vmatprep.subr.mxu0 %v1391_v44 }
 0x38f   : > { %2354 = vmatpush3.msra.mxu0 %v1391_v44 }
 0x390   : > { %2356 = vmatmul.mubr.msk.f32.vlgmr.msra.gmra.mxu0 %vm273_vm0, %v1401_v45  ;;  %2365 = vmatprep.subr.mxu0 %v1487_v46 }
 0x391   : > { %2366 = vmatpush3.msra.mxu0 %v1487_v46  ;;  %2369 = vmatprep.mubr.msk.f32.mxu0 %vm273_vm0, %v2852_v20 }
 0x392   : > { %2367 = vmatprep.subr.mxu0 %v1486_v47 }
 0x393   : > { %2368 = vmatpush3.msra.mxu0 %v1486_v47 }
 0x394   : > { %2370 = vmatmul.mubr.msk.f32.vlgmr.msra.gmra.mxu0 %vm273_vm0, %v2860_v24  ;;  %2379 = vmatprep.subr.mxu0 %v1732_v48 }
 0x395   : > { %2383 = vmatprep.mubr.msk.f32.mxu0 %vm273_vm0, %v2862_v25  ;;  %2380 = vmatpush3.msra.mxu0 %v1732_v48  ;;  %v1557_v25 = vpop.f32.mrf.mxu1 }
 0x396   : > { %2381 = vmatprep.subr.mxu0 %v1731_v50 }
 0x397   : > { %2382 = vmatpush3.msra.mxu0 %v1731_v50 }
 0x398   : > { %2384 = vmatmul.mubr.msk.f32.vlgmr.msra.gmra.mxu0 %vm273_vm0, %v2869_v28  ;;  %v1884_v28 = vld [vmem:[#allocation6 + $0x60] sm:$0xff] }
 0x399   : > { %2397 = vmatprep.mubr.msk.f32.mxu0 %vm273_vm0, %v1884_v28 }
 0x450   : > { %v2357_v51 = vpop.f32.mrf.mxu0 }
 0x451   : > { %v1484_v52 = vadd.f32 %v2357_v51, %v1242_v36 }
 0x452   : > { %v1474_v53 = vpop.f32.mrf.mxu0 }
 0x453   : > { %v1483_v55 = vadd.f32 %v1474_v53, %v1241_v39 }
 0x454   : > { %v2371_v56 = vpop.f32.mrf.mxu0 }
 0x455   : > { %v1638_v57 = vadd.f32 %v2371_v56, %v2364_v54 }
 0x456   : > { %v1632_v58 = vpop.f32.mrf.mxu0 }
 0x457   : > { %v1633_v59 = vadd.f32 %v1632_v58, %v1557_v25  ;;  %2372 = vmatprep.subr.mxu1 %v1638_v57 }
 0x458   : > { %2373 = vmatpush3.msra.mxu1 %v1638_v57  ;;  %v2385_v2 = vpop.f32.mrf.mxu0 }
 0x459   : > { %2374 = vmatprep.subr.mxu1 %v1633_v59 }
 0x45a   : > { %2375 = vmatpush3.msra.mxu1 %v1633_v59  ;;  %v1799_v13 = vpop.f32.mrf.mxu0 }
 0x45b   : > { %2377 = vmatmul.mubr.msk.f32.vlgmr.msra.gmra.mxu1 %vm273_vm0, %v1643_v60  ;;  %2386 = vmatprep.subr.mxu1 %v1729_v61 }
 0x45c   : > { %2387 = vmatpush3.msra.mxu1 %v1729_v61  ;;  %2390 = vmatprep.mubr.msk.f32.mxu1 %vm273_vm0, %v2852_v20  ;;  %v1885_v20 = vld [vmem:[#allocation6 + $0x68] sm:$0xff] }
 0x45d   : > { %2388 = vmatprep.subr.mxu1 %v1728_v62 }
 0x45e   : > { %2389 = vmatpush3.msra.mxu1 %v1728_v62 }
 0x45f   : > { %2391 = vmatmul.mubr.msk.f32.vlgmr.msra.gmra.mxu1 %vm273_vm0, %v2860_v24 }
 0x51b   : > { %v2378_v63 = vpop.f32.mrf.mxu1 }
 0x51c   : > { %v1726_v0 = vadd.f32 %v2378_v63, %v1484_v52 }
 0x51d   : > { %v1716_v1 = vpop.f32.mrf.mxu1 }
 0x51e   : > { %v1725_v6 = vadd.f32 %v1716_v1, %v1483_v55 }
 0x51f   : > { %v2392_v7 = vpop.f32.mrf.mxu1 }
 0x520   : > { %v1880_v9 = vadd.f32 %v2392_v7, %v2385_v2 }
 0x521   : > { %v1874_v14 = vpop.f32.mrf.mxu1 }
 0x522   : > { %v1875_v15 = vadd.f32 %v1874_v14, %v1799_v13  ;;  %2393 = vmatprep.subr.mxu0 %v1880_v9 }
 0x523   : > { %2394 = vmatpush3.msra.mxu0 %v1880_v9 }
 0x524   : > { %2395 = vmatprep.subr.mxu0 %v1875_v15 }
 0x525   : > { %2396 = vmatpush3.msra.mxu0 %v1875_v15 }
 0x526   : > { %2398 = vmatmul.mubr.msk.f32.vlgmr.msra.gmra.mxu0 %vm273_vm0, %v1885_v20 }
 0x5e6   : > { %v2399_v24 = vpop.f32.mrf.mxu0 }
 0x5e7   : > { %v1968_v17 = vadd.f32 %v2399_v24, %v1726_v0 }
 0x5e8   : > { %v1958_v19 = vpop.f32.mrf.mxu0 }
 0x5e9   : > { %v1972_v21 = vadd.f32 %v1970_v16, %v1968_v17  ;;  %v1967_v22 = vadd.f32 %v1958_v19, %v1725_v6 }
 0x5eb   : > { %v1974_v23 = vsub.f32 0.0, %v1972_v21  ;;  %v1971_v26 = vadd.f32 %v1970_v16, %v1967_v22 }
 0x5ed   : > { %v1977_v27 = vmul.f32 1.442695, %v1974_v23  ;;  %v1973_v29 = vsub.f32 0.0, %v1971_v26 }
 0x5ef   : > { %2471 = vpow2.f32 %v1977_v27  ;;  %v1975_v30 = vmul.f32 1.442695, %v1973_v29 }
 0x5f1   : > { %2473 = vpow2.f32 %v1975_v30 }
 0x5fc   : > { %v2472_v31 = vpop.eup %2471 }
 0x5fd   : > { %v1980_v32 = vadd.f32 1.0, %v2472_v31 }
 0x5fe   : > { %v2474_v33 = vpop.eup %2473 }
 0x5ff   : > { %2475 = vrcp.f32 %v1980_v32  ;;  %v1979_v34 = vadd.f32 1.0, %v2474_v33 }
 0x601   : > { %2477 = vrcp.f32 %v1979_v34 }
 0x60c   : > { %v2476_v35 = vpop.eup %2475 }
 0x60d   : > { %v1986_v36 = vmul.f32 %v2476_v35, %v2829_v8  ;;  %v1988_v37 = vmul.f32 %v2476_v35, %v2837_v11  ;;  %v1990_v38 = vmul.f32 %v2476_v35, %v2840_v12  ;;  %v1992_v39 = vmul.f32 %v2476_v35, %v2847_v18 }
 0x60e   : > { %v2478_v40 = vpop.eup %2477 }
 0x60f   : > { %v1985_v8 = vmul.f32 %v2478_v40, %v2818_v3  ;;  %v1987_v11 = vmul.f32 %v2478_v40, %v2821_v4  ;;  %v1989_v12 = vmul.f32 %v2478_v40, %v2824_v5  ;;  %v1991_v18 = vmul.f32 %v2478_v40, %v2834_v10  ;;  %1994 = vst.msk [vmem:[%s245_s5 + $0x8] sm:$0xff] %vm273_vm0, %v1986_v36 }
 0x610   : > { %1996 = vst.msk [vmem:[%s245_s5 + $0x18] sm:$0xff] %vm273_vm0, %v1988_v37  ;;  %1998 = vst.msk [vmem:[%s245_s5 + $0x28] sm:$0xff] %vm273_vm0, %v1990_v38 }
 0x611   : > { %2000 = vst.msk [vmem:[%s245_s5 + $0x38] sm:$0xff] %vm273_vm0, %v1992_v39  ;;  %1993 = vst.msk [vmem:[%s245_s5] sm:$0xff] %vm273_vm0, %v1985_v8 }
 0x612   : > { %1995 = vst.msk [vmem:[%s245_s5 + $0x10] sm:$0xff] %vm273_vm0, %v1987_v11  ;;  %1997 = vst.msk [vmem:[%s245_s5 + $0x20] sm:$0xff] %vm273_vm0, %v1989_v12 }
 0x613   : > { %1999 = vst.msk [vmem:[%s245_s5 + $0x30] sm:$0xff] %vm273_vm0, %v1991_v18 }
 0x614   : > { %2572 = shalt.err (!%p2569_p3)
}
 0x615   : > { %s2573_s27 = scalar_lea.hbm %s2945_s9, 1024  ;;  %s2577_s11 = scalar_lea.hbm %s3006_s4, 2048 }
 0x616   : > { %p2574_p11 = scmp.ne.s32.totalorder %s2945_s9, %s2573_s27  ;;  %p2578_p4 = scmp.lt.s32.totalorder %s2945_s9, %s3006_s4 }
 0x617   : > { %p2579_p6 = scmp.lt.s32.totalorder %s2577_s11, %s2573_s27 }
 0x618   : > { %p2575_p9 = pnand %p2574_p11, %p3021_p2 }
 0x619   : > { %p2580_p8 = por %p2579_p6, %p2578_p4 }
 0x61a   : > { %p2576_p1 = pneg %p2575_p9 }
 0x61c   : > { %p2581_p5 = pnand %p2580_p8, %p2576_p1 }
 0x61e   : > { %2584 = shalt.err (!%p2581_p5)
}
 0x61f   : > { %s2635_s22 = smov 128   ;;  %s2636_s24 = smov 8  }
 0x620   : > { %2410 = dma.vmem_to_hbm [thread:$0]  (%p3021_p2), %s2947_s6, 1024, %s2945_s9, %s2002_s3, %s2635_s22, %s2635_s22, %s2636_s24  }
 0x621 PF: > { %s2030_s5 = sand.u32 1, %s2615_s17   ;;  %p3022_p7 = scmp.ne.s32.totalorder %s3012_s23, 0 }
 0x622   : > { %p3023_p12 = scmp.ge.s32.totalorder %s2627_s20, 2  ;;  %s2031_s29 = scalar_lea.sflag [#allocation5], %s2030_s5 }
 0x624   : > { %p2424_p13 = pnand %p3023_p12, %p3022_p7 }
 0x626   : > { %p2425_p0 = pneg %p2424_p13 }
 0x628   : > { %2610 = dma.done.wait (%p2425_p0), %s2031_s29, 1024  }
 0x629   : > { %2612 = vsyncadd (%p2425_p0), %s2031_s29, 4294966272  ;;  %p19_p10 = scmp.ge.s32.totalorder %s2743_s12, 4   ;;  %s3024_s17 = smov %s2619_s18 }
 0x62a   : > { %s3025_s18 = smov %s2623_s19  ;;  %s3026_s19 = smov %s2759_s16 }
 0x62b   : > { %s3027_s20 = smov %s2743_s12  ;;  %21 = sbr.rel (!%p19_p10) target bundleno = 8 (0x8), region = 108 }
 0x630   :  { %2036 = vsyncpa [#allocation4], 1 }
 0x631   :  { %2038 = vsyncpa [#allocation4 + $0x1], 1 }
 0x632   :  { %2039 = vsyncpa [#allocation7], 1 }
 0x633   :  { %2040 = vsyncpa [#allocation5], 1 }
 0x634   :  { %2042 = vsyncpa [#allocation5 + $0x1], 1 }

</bundles_post_ra>
